<compile_context>
chip_gen: v6e
topology: v6e:2x2x1
jax: 0.10.0
libtpu: 0.0.40
codegen_flags: <defaults>
</compile_context>

<pallas_src>
from typing import NamedTuple

import jax
import jax.numpy as jnp
from jax.experimental import pallas as pl
from jax.experimental.pallas import tpu as pltpu


def _round_up(x, m):
    return (x + m - 1) // m * m


def _cdiv(a, b):
    return -(-a // b)


def _divisors_desc(m):
    ds = set()
    i = 1
    while i * i <= m:
        if m % i == 0:
            ds.add(i)
            ds.add(m // i)
        i += 1
    return sorted(ds, reverse=True)


def _vmem_capacity_bytes():
    try:
        return int(pltpu.get_tpu_info().vmem_capacity_bytes)
    except Exception:
        return 64 << 20  # conservative fallback (v7x per-TC VMEM)


_HAS_BUFFERED = hasattr(pl, "Buffered")


def _spec(shape, index_map, single_buffer):
    """BlockSpec; resident (constant index_map) operands get a single buffer."""
    if single_buffer and _HAS_BUFFERED:
        try:
            return pl.BlockSpec(shape, index_map, pipeline_mode=pl.Buffered(1))
        except TypeError:  # older BlockSpec without pipeline_mode
            pass
    return pl.BlockSpec(shape, index_map)


class FFNParams(NamedTuple):
    w1a: jax.Array   # (dim_k, hid_p)  mm_dtype
    w1b: jax.Array   # (dim_k, hid_p)  mm_dtype
    w2:  jax.Array   # (hid_p, dim_o)  mm_dtype
    b1a: jax.Array   # (1, hid_p)      f32
    b1b: jax.Array   # (1, hid_p)      f32
    b2:  jax.Array   # (1, dim_o)      f32
    dim: int
    hidden: int


def prepare_ffn_params(w1, b1, w2, b2, *, use_bf16=True):
    """One-time (load-time) weight prep: split GEGLU halves, pad, cast.

    w1: (dim, 2*hidden), b1: (2*hidden,), w2: (hidden, dim), b2: (dim,).
    """
    dim, two_hidden = w1.shape
    hidden = two_hidden // 2
    assert w1.shape == (dim, 2 * hidden) and w2.shape == (hidden, dim)
    mm_dtype = jnp.bfloat16 if use_bf16 else jnp.float32

    dim_k = _round_up(dim, 8)      # K dim of first matmul: sublane-aligned only
    dim_o = _round_up(dim, 128)    # output lane dim: lane-dense unmasked stores
    hid_p = _round_up(hidden, 128)

    def pad2(m, r, c):
        return jnp.pad(m, ((0, r - m.shape[0]), (0, c - m.shape[1])))

    w1a = pad2(w1[:, :hidden].astype(mm_dtype), dim_k, hid_p)
    w1b = pad2(w1[:, hidden:].astype(mm_dtype), dim_k, hid_p)
    w2p = pad2(w2.astype(mm_dtype), hid_p, dim_o)
    b1a = jnp.pad(b1[:hidden].astype(jnp.float32), (0, hid_p - hidden)).reshape(1, hid_p)
    b1b = jnp.pad(b1[hidden:].astype(jnp.float32), (0, hid_p - hidden)).reshape(1, hid_p)
    b2p = jnp.pad(b2.astype(jnp.float32), (0, dim_o - dim)).reshape(1, dim_o)
    return FFNParams(w1a, w1b, w2p, b1a, b1b, b2p, dim, hidden)


def _ffn_kernel(x_ref, w1a_ref, w1b_ref, b1a_ref, b1b_ref, w2_ref, b2_ref,
                o_ref, acc_ref):
    h = pl.program_id(1)

    @pl.when(h == 0)
    def _():
        acc_ref[...] = jnp.zeros_like(acc_ref)

    x = x_ref[...]                                            # (tn, dim_k)

    # First linear on this hidden chunk, pre-split GEGLU halves (no (tn, 2H)
    # intermediate and no lane slicing inside the kernel).
    a = jnp.dot(x, w1a_ref[...], preferred_element_type=jnp.float32) + b1a_ref[...]
    g = jnp.dot(x, w1b_ref[...], preferred_element_type=jnp.float32) + b1b_ref[...]

    # Exact (erf) GELU in f32, matching torch.nn.functional.gelu default.
    inv_sqrt2 = jnp.float32(0.7071067811865476)
    u = a * (0.5 * g * (1.0 + jax.lax.erf(g * inv_sqrt2)))    # (tn, th) f32

    # Second linear: accumulate this hidden chunk's contribution in f32.
    acc_ref[...] += jnp.dot(u.astype(w2_ref.dtype), w2_ref[...],
                            preferred_element_type=jnp.float32)

    @pl.when(h == pl.num_programs(1) - 1)
    def _():
        o_ref[...] = (acc_ref[...] + b2_ref[...]).astype(o_ref.dtype)


def _vmem_estimate(tn, th, h_steps, dim_k, dim_o, elt, out_elt):
    wbuf = 1 if h_steps == 1 else 2                # Buffered(1) when fully resident
    return (2 * wbuf * dim_k * th * elt            # w1a, w1b chunks
            + wbuf * th * dim_o * elt              # w2 chunk
            + 2 * wbuf * th * 4 + dim_o * 4        # b1a, b1b, b2 (f32)
            + 2 * tn * dim_k * elt                 # x tile (double-buffered)
            + 2 * tn * dim_o * out_elt             # out tile (double-buffered)
            + tn * dim_o * 4                       # f32 accumulator scratch
            + 3 * tn * th * 4)                     # live f32 a / g / u


def feed_forward_pallas(x, params: FFNParams, *, block_rows=None):
    """x: (batch, seq, dim) -> (batch, seq, dim), same dtype as x."""
    out_dtype = x.dtype
    batch, seq, dim = x.shape
    assert dim == params.dim
    mm_dtype = params.w1a.dtype
    dim_k, hid_p = params.w1a.shape
    dim_o = params.w2.shape[1]
    elt = jnp.dtype(mm_dtype).itemsize
    out_elt = jnp.dtype(out_dtype).itemsize

    n = batch * seq
    cap = _vmem_capacity_bytes()
    budget = int(0.75 * cap)                       # headroom for Mosaic scratch
    if block_rows is None:
        block_rows = 1024 if cap >= (96 << 20) else 512   # bigger tiles on 128 MiB parts

    # --- row tiling: pad N only to a multiple of 8; rebalance to minimize overshoot.
    n8 = _round_up(n, 8)
    tn = max(8, min(_round_up(block_rows, 8), n8))
    th_cands = [128 * d for d in _divisors_desc(hid_p // 128)]

    # Choose the hidden-chunk width (largest that fits the VMEM budget);
    # if even a 128-wide chunk doesn't fit, shrink the row tile and retry.
    while True:
        th = next((c for c in th_cands
                   if _vmem_estimate(tn, c, hid_p // c, dim_k, dim_o, elt, out_elt)
                   <= budget), None)
        if th is not None or tn <= 256:
            if th is None:
                th = th_cands[-1]                  # best effort: smallest chunk
            break
        tn = max(8, _round_up(tn // 2, 8))

    row_steps = _cdiv(n8, tn)
    if row_steps < 2 and n8 >= 16:
        row_steps = 2                              # keep both v7x TensorCores busy
    tn = _round_up(_cdiv(n8, row_steps), 8)
    n_p = row_steps * tn
    h_steps = hid_p // th

    # --- activations: cast to matmul dtype FIRST, then pad (minimal HBM traffic).
    x2d = x.reshape(n, dim).astype(mm_dtype)
    if n_p != n or dim_k != dim:
        x2d = jnp.pad(x2d, ((0, n_p - n), (0, dim_k - dim)))

    est = _vmem_estimate(tn, th, h_steps, dim_k, dim_o, elt, out_elt)
    vmem_limit = int(min(max(1.35 * est, 32 << 20), budget))

    single = (h_steps == 1)                        # weights fully resident
    in_specs = [
        pl.BlockSpec((tn, dim_k), lambda i, h: (i, 0)),        # x (pipelined rows)
        _spec((dim_k, th), lambda i, h: (0, h), single),       # w1a
        _spec((dim_k, th), lambda i, h: (0, h), single),       # w1b
        _spec((1, th),     lambda i, h: (0, h), single),       # b1a
        _spec((1, th),     lambda i, h: (0, h), single),       # b1b
        _spec((th, dim_o), lambda i, h: (h, 0), single),       # w2
        _spec((1, dim_o),  lambda i, h: (0, 0), True),         # b2 (always resident)
    ]
    out_specs = pl.BlockSpec((tn, dim_o), lambda i, h: (i, 0))

    out2d = pl.pallas_call(
        _ffn_kernel,
        out_shape=jax.ShapeDtypeStruct((n_p, dim_o), out_dtype),
        grid_spec=pltpu.PrefetchScalarGridSpec(
            num_scalar_prefetch=0,
            grid=(row_steps, h_steps),
            in_specs=in_specs,
            out_specs=out_specs,
            scratch_shapes=[pltpu.VMEM((tn, dim_o), jnp.float32)],
        ),
        compiler_params=pltpu.CompilerParams(
            dimension_semantics=("parallel", "arbitrary"),
            vmem_limit_bytes=vmem_limit,
        ),
    )(x2d, params.w1a, params.w1b, params.b1a, params.b1b, params.w2, params.b2)

    out = out2d
    if n_p != n or dim_o != dim:
        out = out[:n, :dim]
    return out.reshape(batch, seq, dim)


def feed_forward_pallas_raw(x, w1, b1, w2, b2, *, use_bf16=True, block_rows=None):
    """Convenience wrapper (prepares weights per call; prefer prepare_ffn_params)."""
    return feed_forward_pallas(
        x, prepare_ffn_params(w1, b1, w2, b2, use_bf16=use_bf16),
        block_rows=block_rows)


def init_feed_forward_params(key, dim, mult=4, dtype=jnp.float32):
    """Deterministic parameter init mimicking nn.Linear shapes (stored transposed)."""
    hidden = dim * mult
    k1, k2, k3, k4 = jax.random.split(key, 4)
    bound1 = 1.0 / jnp.sqrt(dim)
    w1 = jax.random.uniform(k1, (dim, 2 * hidden), dtype, -bound1, bound1)
    b1 = jax.random.uniform(k2, (2 * hidden,), dtype, -bound1, bound1)
    bound2 = 1.0 / jnp.sqrt(hidden)
    w2 = jax.random.uniform(k3, (hidden, dim), dtype, -bound2, bound2)
    b2 = jax.random.uniform(k4, (dim,), dtype, -bound2, bound2)
    return w1, b1, w2, b2


def feed_forward_ref(x, w1, b1, w2, b2):
    """Pure-JAX f32 reference for verification."""
    h = x @ w1 + b1
    a, g = jnp.split(h, 2, axis=-1)
    u = a * (0.5 * g * (1.0 + jax.lax.erf(g / jnp.sqrt(2.0))))
    return u @ w2 + b2


if __name__ == "__main__":
    batch, seq, dim, mult = 2, 8, 32, 4

    key = jax.random.PRNGKey(0)
    kx, kp = jax.random.split(key)
    x = jax.random.normal(kx, (batch, seq, dim), jnp.float32)
    w1, b1, w2, b2 = init_feed_forward_params(kp, dim, mult)

    ref = feed_forward_ref(x, w1, b1, w2, b2)

    # Exact-f32 path: verification-only (faithful to the PyTorch module numerics).
    out_f32 = jax.block_until_ready(
        feed_forward_pallas_raw(x, w1, b1, w2, b2, use_bf16=False))
    assert out_f32.shape == (batch, seq, dim)
    assert jnp.allclose(out_f32, ref, atol=1e-4, rtol=1e-4), "f32 path mismatch"

    # Production path: bf16 MXU operands, f32 accumulation + f32 erf-GELU epilogue;
    # weights prepared once (load-time) and reused across forward calls.
    params = prepare_ffn_params(w1, b1, w2, b2, use_bf16=True)
    out_bf16 = jax.block_until_ready(feed_forward_pallas(x, params))
    assert out_bf16.shape == (batch, seq, dim)
    assert jnp.allclose(out_bf16, ref, atol=5e-2, rtol=5e-2), "bf16 path mismatch"

    print("KERNEL_OK")
</pallas_src>

<mosaic_0001>
module attributes {stable_mosaic.version = 11 : i64} {
  func.func @_ffn_kernel(%arg0: i32, %arg1: i32, %arg2: memref<8x32xf32, #tpu.memory_space<vmem>>, %arg3: memref<32x128xf32, #tpu.memory_space<vmem>>, %arg4: memref<32x128xf32, #tpu.memory_space<vmem>>, %arg5: memref<1x128xf32, #tpu.memory_space<vmem>>, %arg6: memref<1x128xf32, #tpu.memory_space<vmem>>, %arg7: memref<128x128xf32, #tpu.memory_space<vmem>>, %arg8: memref<1x128xf32, #tpu.memory_space<vmem>>, %arg9: memref<8x128xf32, #tpu.memory_space<vmem>>, %arg10: memref<8x128xf32, #tpu.memory_space<vmem>>) attributes {dimension_semantics = [#tpu.dimension_semantics<parallel>, #tpu.dimension_semantics<arbitrary>], iteration_bounds = array<i64: 2, 1>, scalar_prefetch = 0 : i64, scratch_operands = 1 : i64, tpu.core_type = #tpu.core_type<tc>, window_params = [{transform_indices = @transform_0, window_bounds = array<i64: 8, 32>}, {pipeline_mode = #tpu.pipeline_mode<synchronous>, transform_indices = @transform_1, window_bounds = array<i64: 32, 128>}, {pipeline_mode = #tpu.pipeline_mode<synchronous>, transform_indices = @transform_2, window_bounds = array<i64: 32, 128>}, {pipeline_mode = #tpu.pipeline_mode<synchronous>, transform_indices = @transform_3, window_bounds = array<i64: 1, 128>}, {pipeline_mode = #tpu.pipeline_mode<synchronous>, transform_indices = @transform_4, window_bounds = array<i64: 1, 128>}, {pipeline_mode = #tpu.pipeline_mode<synchronous>, transform_indices = @transform_5, window_bounds = array<i64: 128, 128>}, {pipeline_mode = #tpu.pipeline_mode<synchronous>, transform_indices = @transform_6, window_bounds = array<i64: 1, 128>}, {transform_indices = @transform_7, window_bounds = array<i64: 8, 128>}]} {
    %c0_i32 = arith.constant 0 : i32
    %0 = arith.cmpi eq, %arg1, %c0_i32 : i32
    %1 = arith.extui %0 : i1 to i32
    %c0_i32_0 = arith.constant 0 : i32
    %2 = arith.cmpi ne, %1, %c0_i32_0 : i32
    scf.if %2 {
      %cst_23 = arith.constant 0.000000e+00 : f32
      %31 = vector.broadcast %cst_23 : f32 to vector<8x128xf32>
      %c0_24 = arith.constant 0 : index
      %c0_25 = arith.constant 0 : index
      %32 = vector.load %arg10[%c0_24, %c0_25] : memref<8x128xf32, #tpu.memory_space<vmem>>, vector<8x128xf32>
      tpu.vector_store %arg10[%c0_24, %c0_25], %31 {strides = array<i32>} : memref<8x128xf32, #tpu.memory_space<vmem>>, vector<8x128xf32>,
    } else {
    }
    %c0 = arith.constant 0 : index
    %c0_1 = arith.constant 0 : index
    %3 = vector.load %arg2[%c0, %c0_1] : memref<8x32xf32, #tpu.memory_space<vmem>>, vector<8x32xf32>
    %c0_2 = arith.constant 0 : index
    %c0_3 = arith.constant 0 : index
    %4 = vector.load %arg3[%c0_2, %c0_3] : memref<32x128xf32, #tpu.memory_space<vmem>>, vector<32x128xf32>
    %cst = arith.constant dense<0.000000e+00> : vector<8x128xf32>
    %5 = tpu.matmul %3, %4, %cst {dimension_numbers = #tpu.dot_dimension_numbers<[1], [0], [0], [1], [0, 0, 1, 1], [], []>} : vector<8x32xf32>, vector<32x128xf32>, vector<8x128xf32> -> vector<8x128xf32>
    %c0_4 = arith.constant 0 : index
    %c0_5 = arith.constant 0 : index
    %6 = vector.load %arg5[%c0_4, %c0_5] : memref<1x128xf32, #tpu.memory_space<vmem>>, vector<1x128xf32>
    %7 = vector.broadcast %6 : vector<1x128xf32> to vector<8x128xf32>
    %8 = arith.addf %5, %7 : vector<8x128xf32>
    %c0_6 = arith.constant 0 : index
    %c0_7 = arith.constant 0 : index
    %9 = vector.load %arg4[%c0_6, %c0_7] : memref<32x128xf32, #tpu.memory_space<vmem>>, vector<32x128xf32>
    %cst_8 = arith.constant dense<0.000000e+00> : vector<8x128xf32>
    %10 = tpu.matmul %3, %9, %cst_8 {dimension_numbers = #tpu.dot_dimension_numbers<[1], [0], [0], [1], [0, 0, 1, 1], [], []>} : vector<8x32xf32>, vector<32x128xf32>, vector<8x128xf32> -> vector<8x128xf32>
    %c0_9 = arith.constant 0 : index
    %c0_10 = arith.constant 0 : index
    %11 = vector.load %arg6[%c0_9, %c0_10] : memref<1x128xf32, #tpu.memory_space<vmem>>, vector<1x128xf32>
    %12 = vector.broadcast %11 : vector<1x128xf32> to vector<8x128xf32>
    %13 = arith.addf %10, %12 : vector<8x128xf32>
    %cst_11 = arith.constant 5.000000e-01 : f32
    %14 = vector.broadcast %cst_11 : f32 to vector<8x128xf32>
    %15 = arith.mulf %14, %13 : vector<8x128xf32>
    %cst_12 = arith.constant 0.707106769 : f32
    %16 = vector.broadcast %cst_12 : f32 to vector<8x128xf32>
    %17 = arith.mulf %13, %16 : vector<8x128xf32>
    %18 = math.erf %17 : vector<8x128xf32>
    %cst_13 = arith.constant 1.000000e+00 : f32
    %19 = vector.broadcast %cst_13 : f32 to vector<8x128xf32>
    %20 = arith.addf %19, %18 : vector<8x128xf32>
    %21 = arith.mulf %15, %20 : vector<8x128xf32>
    %22 = arith.mulf %8, %21 : vector<8x128xf32>
    %c0_14 = arith.constant 0 : index
    %c0_15 = arith.constant 0 : index
    %23 = vector.load %arg10[%c0_14, %c0_15] : memref<8x128xf32, #tpu.memory_space<vmem>>, vector<8x128xf32>
    %c0_16 = arith.constant 0 : index
    %c0_17 = arith.constant 0 : index
    %24 = vector.load %arg7[%c0_16, %c0_17] : memref<128x128xf32, #tpu.memory_space<vmem>>, vector<128x128xf32>
    %cst_18 = arith.constant dense<0.000000e+00> : vector<8x128xf32>
    %25 = tpu.matmul %22, %24, %cst_18 {dimension_numbers = #tpu.dot_dimension_numbers<[1], [0], [0], [1], [0, 0, 1, 1], [], []>} : vector<8x128xf32>, vector<128x128xf32>, vector<8x128xf32> -> vector<8x128xf32>
    %26 = arith.addf %23, %25 : vector<8x128xf32>
    %c0_19 = arith.constant 0 : index
    %c0_20 = arith.constant 0 : index
    %27 = vector.load %arg10[%c0_19, %c0_20] : memref<8x128xf32, #tpu.memory_space<vmem>>, vector<8x128xf32>
    tpu.vector_store %arg10[%c0_19, %c0_20], %26 {strides = array<i32>} : memref<8x128xf32, #tpu.memory_space<vmem>>, vector<8x128xf32>,
    %c0_i32_21 = arith.constant 0 : i32
    %28 = arith.cmpi eq, %arg1, %c0_i32_21 : i32
    %29 = arith.extui %28 : i1 to i32
    %c0_i32_22 = arith.constant 0 : i32
    %30 = arith.cmpi ne, %29, %c0_i32_22 : i32
    scf.if %30 {
      %c0_23 = arith.constant 0 : index
      %c0_24 = arith.constant 0 : index
      %31 = vector.load %arg10[%c0_23, %c0_24] : memref<8x128xf32, #tpu.memory_space<vmem>>, vector<8x128xf32>
      %c0_25 = arith.constant 0 : index
      %c0_26 = arith.constant 0 : index
      %32 = vector.load %arg8[%c0_25, %c0_26] : memref<1x128xf32, #tpu.memory_space<vmem>>, vector<1x128xf32>
      %33 = vector.broadcast %32 : vector<1x128xf32> to vector<8x128xf32>
      %34 = arith.addf %31, %33 : vector<8x128xf32>
      %c0_27 = arith.constant 0 : index
      %c0_28 = arith.constant 0 : index
      %35 = vector.load %arg9[%c0_27, %c0_28] : memref<8x128xf32, #tpu.memory_space<vmem>>, vector<8x128xf32>
      tpu.vector_store %arg9[%c0_27, %c0_28], %34 {strides = array<i32>} : memref<8x128xf32, #tpu.memory_space<vmem>>, vector<8x128xf32>,
    } else {
    }
    return
  }
  func.func @transform_0(%arg0: i32, %arg1: i32) -> (i32, i32) {
    %c0_i32 = arith.constant 0 : i32
    %c0_i32_0 = arith.constant 0 : i32
    return %arg0, %c0_i32 : i32, i32
  }
  func.func @transform_1(%arg0: i32, %arg1: i32) -> (i32, i32) {
    %c0_i32 = arith.constant 0 : i32
    %c0_i32_0 = arith.constant 0 : i32
    return %c0_i32, %arg1 : i32, i32
  }
  func.func @transform_2(%arg0: i32, %arg1: i32) -> (i32, i32) {
    %c0_i32 = arith.constant 0 : i32
    %c0_i32_0 = arith.constant 0 : i32
    return %c0_i32, %arg1 : i32, i32
  }
  func.func @transform_3(%arg0: i32, %arg1: i32) -> (i32, i32) {
    %c0_i32 = arith.constant 0 : i32
    %c0_i32_0 = arith.constant 0 : i32
    return %c0_i32, %arg1 : i32, i32
  }
  func.func @transform_4(%arg0: i32, %arg1: i32) -> (i32, i32) {
    %c0_i32 = arith.constant 0 : i32
    %c0_i32_0 = arith.constant 0 : i32
    return %c0_i32, %arg1 : i32, i32
  }
  func.func @transform_5(%arg0: i32, %arg1: i32) -> (i32, i32) {
    %c0_i32 = arith.constant 0 : i32
    %c0_i32_0 = arith.constant 0 : i32
    return %arg1, %c0_i32 : i32, i32
  }
  func.func @transform_6(%arg0: i32, %arg1: i32) -> (i32, i32) {
    %c0_i32 = arith.constant 0 : i32
    %c0_i32_0 = arith.constant 0 : i32
    %c0_i32_1 = arith.constant 0 : i32
    return %c0_i32, %c0_i32_0 : i32, i32
  }
  func.func @transform_7(%arg0: i32, %arg1: i32) -> (i32, i32) {
    %c0_i32 = arith.constant 0 : i32
    %c0_i32_0 = arith.constant 0 : i32
    return %arg0, %c0_i32 : i32, i32
  }
}

</mosaic_0001>

<bundles_post_ra>
// kernel: tpu_custom_call.1
= control target key start
LH: loop header
LB: loop body
LE: loop exit
PB: predicated region body
PF: predicated region fallthrough
CT: control target
= control target key end

     0   :  { %s1523_s0 = inlined_call_operand.hbm [shape: f32[16,32], index: 0, kind: input, shape index: {}]   ;;  %s1524_s1 = inlined_call_operand.hbm [shape: f32[32,128], index: 1, kind: input, shape index: {}]   ;;  %s1525_s2 = inlined_call_operand.hbm [shape: f32[32,128], index: 2, kind: input, shape index: {}]   ;;  %s1526_s3 = inlined_call_operand.vmem [shape: f32[1,128], index: 3, kind: input, shape index: {}]   ;;  %s1527_s4 = inlined_call_operand.vmem [shape: f32[1,128], index: 4, kind: input, shape index: {}]   ;;  %s1528_s5 = inlined_call_operand.hbm [shape: f32[128,128], index: 5, kind: input, shape index: {}]   ;;  %s1529_s6 = inlined_call_operand.vmem [shape: f32[1,128], index: 6, kind: input, shape index: {}]   ;;  %s1530_s7 = inlined_call_operand.hbm [shape: f32[16,128], index: 7, kind: output, shape index: {}]  }
   0x1   :  { %1535 = sst [smem:[#allocation16_spill]] %s1524_s1 }
   0x2   :  { %1536 = sst [smem:[#allocation17_spill]] %s1525_s2 }
   0x3   :  { %1537 = sst [smem:[#allocation18_spill]] %s1528_s5 }
   0x4   :  { %12 = vsyncpa [#allocation4], 0 }
   0x5   :  { %14 = vsyncpa [#allocation4 + $0x1], 0 }
   0x6   :  { %15 = vsyncpa [#allocation7], 0 }
   0x7   :  { %16 = vsyncpa [#allocation10], 0 }
   0x8   :  { %17 = vsyncpa [#allocation5], 0 }
   0x9   :  { %19 = vsyncpa [#allocation5 + $0x1], 0  ;;  %s1286_s24 = smov 0   ;;  %s1288_s25 = smov 0  }
   0xa   :  { %s1290_s26 = smov 0   ;;  %s1292_s27 = smov 0  }
   0xb   :  { %s1294_s28 = smov 0   ;;  %s1296_s29 = smov 0  }
   0xc LB: > { %s832_s30 = sadd.s32 4294967295, %s1235_s29   ;;  %s833_s8 = sadd.s32 4294967294, %s1235_s29   ;;  %s1235_s29 = sphi %s1296_s29, %s25_s29   ;;  %s1231_s28 = sphi %s1294_s28, %s1558_s28   ;;  %s1227_s27 = sphi %s1292_s27, %s1557_s27   ;;  %s1223_s26 = sphi %s1290_s26, %s1556_s26   ;;  %s1219_s25 = sphi %s1288_s25, %s1555_s25   ;;  %s1215_s24 = sphi %s1286_s24, %s1554_s24  }
   0xd   : > { %p57_p0 = scmp.ne.s32.totalorder %s1219_s25, %s1215_s24  ;;  %p1320_p1 = scmp.eq.s32.totalorder %s832_s30, 0 }
   0xe   : > { %p1324_p2 = scmp.eq.s32.totalorder %s832_s30, 1  ;;  %p238_p3 = scmp.eq.s32.totalorder %s833_s8, 1 }
   0xf   : > { %s1538_s9 = scalar_select %p1320_p1, 1, 0 }
  0x10   : > { %p1330_p4 = por %p1320_p1, %p57_p0  ;;  %p834_p5 = scmp.ge.s32.totalorder %s1235_s29, 1 }
  0x11   : > { %p1335_p6 = por %p238_p3, %p57_p0  ;;  %p245_p7 = scmp.lt.s32.totalorder %s1235_s29, 3 }
  0x12   : > { %s1540_s11 = scalar_select %p1330_p4, 1, 0 }
  0x13   : > { %s1541_s12 = scalar_select %p1335_p6, 1, 0 }
  0x14   : > { %p1340_p8 = pnand %p834_p5, %p245_p7  ;;  %s1237_s14 = smov [#allocation6]  }
  0x15   : > { %s259_s15 = sshll.u32 %s1237_s14, 4  ;;  %s1238_s17 = smov [#allocation8]   ;;  %s260_s15 = int_to_ptr.vmem [resolvable:$true] %s259_s15 }
  0x16   : > { %s1542_s13 = scalar_select %p1340_p8, 1, 0 }
  0x17   : > { %p958_p9 = pneg %p1340_p8  ;;  %s274_s18 = sshll.u32 %s1238_s17, 4  ;;  %s275_s18 = int_to_ptr.vmem [resolvable:$true] %s274_s18 }
  0x18   : > { %s1239_s19 = smov [#allocation9]   ;;  %s1052_s21 = scalar_lea.vmem %s260_s15, 512 }
  0x19   : > { %p1349_p11 = pnand %p958_p9, %p1320_p1  ;;  %s302_s20 = sshll.u32 %s1239_s19, 4  ;;  %s303_s20 = int_to_ptr.vmem [resolvable:$true] %s302_s20 }
  0x1a   : > { %p1053_p13 = scmp.ne.s32.totalorder %s260_s15, %s1052_s21  ;;  %p1060_p5 = scmp.lt.s32.totalorder %s260_s15, %s260_s15 }
  0x1b   : > { %p1043_p12 = pneg %p1349_p11  ;;  %p1061_p7 = scmp.lt.s32.totalorder %s1052_s21, %s1052_s21 }
  0x1d   : > { %p1055_p0 = pnand %p1053_p13, %p1043_p12  ;;  %p1062_p9 = por %p1061_p7, %p1060_p5 }
  0x1f   : > { %p1056_p3 = pneg %p1055_p0 }
  0x21   : > { %p1063_p10 = pnand %p1062_p9, %p1056_p3 }
  0x23   : > { %1066 = shalt.err (!%p1063_p10)
}
  0x24   : > { %s1240_s22 = smov 128   ;;  %s1241_s23 = smov 8  }
  0x25   : > { %s1544_s1 = sld [smem:[#allocation16_spill]]  ;;  %s1078_s14 = scalar_lea.vmem %s275_s18, 512 }
  0x26   : > { %p1079_p6 = scmp.ne.s32.totalorder %s275_s18, %s1078_s14  ;;  %p1086_p1 = scmp.lt.s32.totalorder %s275_s18, %s275_s18 }
  0x27   : > { %p1087_p4 = scmp.lt.s32.totalorder %s1078_s14, %s1078_s14 }
  0x28   : > { %p1081_p13 = pnand %p1079_p6, %p1043_p12 }
  0x29   : > { %p1088_p5 = por %p1087_p4, %p1086_p1 }
  0x2a   : > { %p1082_p0 = pneg %p1081_p13 }
  0x2b   : > { %961 = dma.hbm_to_vmem [thread:$0]  (!%p1349_p11), %s1544_s1, 512, %s260_s15, [#allocation7], %s1240_s22, %s1240_s22, %s1241_s23  }
  0x2c   : > { %p1089_p3 = pnand %p1088_p5, %p1082_p0 }
  0x2e   : > { %1092 = shalt.err (!%p1089_p3)
}
  0x2f   : > { %s1545_s2 = sld [smem:[#allocation17_spill]]  ;;  %s1104_s15 = scalar_lea.vmem %s303_s20, 2048 }
  0x30   : > { %p1105_p10 = scmp.ne.s32.totalorder %s303_s20, %s1104_s15  ;;  %p1112_p9 = scmp.lt.s32.totalorder %s303_s20, %s303_s20 }
  0x31   : > { %p1113_p13 = scmp.lt.s32.totalorder %s1104_s15, %s1104_s15 }
  0x32   : > { %p1107_p7 = pnand %p1105_p10, %p1043_p12 }
  0x33   : > { %p1114_p8 = por %p1113_p13, %p1112_p9 }
  0x34   : > { %p1108_p6 = pneg %p1107_p7 }
  0x35   : > { %964 = dma.hbm_to_vmem [thread:$0]  (!%p1349_p11), %s1545_s2, 512, %s275_s18, [#allocation7], %s1240_s22, %s1240_s22, %s1241_s23  }
  0x36   : > { %p1115_p1 = pnand %p1114_p8, %p1108_p6 }
  0x38   : > { %1118 = shalt.err (!%p1115_p1)
}
  0x39   : > { %s1546_s5 = sld [smem:[#allocation18_spill]]  ;;  %s44_s18 = sadd.s32 1, %s1223_s26 }
  0x3a   : > { %s37_s8 = sadd.s32 1, %s1231_s28  ;;  %p51_p4 = scmp.ne.s32.totalorder %s1223_s26, %s1219_s25 }
  0x3b   : > { %p39_p8 = scmp.ge.s32.totalorder %s37_s8, 2  ;;  %p52_p12 = scmp.eq.s32.totalorder %s1235_s29, 0 }
  0x3c   : > { %p1386_p0 = por %p1324_p2, %p51_p4  ;;  %p979_p5 = scmp.lt.s32.totalorder %s1235_s29, 2 }
  0x3d   : > { %s1560_s8 = smov (%p39_p8, %s37_s8), 0  ;;  %p53_p3 = por %p52_p12, %p51_p4 }
  0x3e   : > { %s319_s14 = sand.u32 1, %s1223_s26   ;;  %s41_s17 = ssub.s32 %s1231_s28, %s1560_s8 }
  0x3f   : > { %967 = dma.hbm_to_vmem [thread:$0]  (!%p1349_p11), %s1546_s5, 2048, %s303_s20, [#allocation10], %s1240_s22, %s1240_s22, %s1241_s23  }
  0x40   : > { %p42_p10 = scmp.eq.s32.totalorder %s41_s17, 0  ;;  %s841_s20 = sshll.u32 %s319_s14, 3 }
  0x41   : > { %s842_s22 = sshll.u32 %s1231_s28, 7  ;;  %s323_s21 = scalar_lea.vmem [#allocation3], %s841_s20 }
  0x42   : > { %s1398_s23 = scalar_select %p42_p10, %s1223_s26, %s44_s18  }
  0x43   : > { %s328_s10 = scalar_lea.hbm %s1523_s0, %s842_s22  ;;  %s330_s30 = sshll.u32 %s323_s21, 4  ;;  %s331_s30 = int_to_ptr.vmem [resolvable:$true] %s330_s30 }
  0x44   : > { %p1405_p2 = pnand %p979_p5, %p53_p3  ;;  %s320_s2 = scalar_lea.sflag [#allocation4], %s319_s14 }
  0x45   : > { %s1132_s17 = scalar_lea.vmem %s331_s30, 128  ;;  %s1242_s18 = smov [#allocation3]  }
  0x46   : > { %p1121_p11 = pneg %p1405_p2  ;;  %p1133_p7 = scmp.ne.s32.totalorder %s331_s30, %s1132_s17 }
  0x47   : > { %s1137_s5 = sshll.u32 %s1242_s18, 4  ;;  %s1138_s5 = int_to_ptr.vmem [resolvable:$false] %s1137_s5 }
  0x48   : > { %p1135_p6 = pnand %p1133_p7, %p1121_p11  ;;  %s1139_s22 = scalar_lea.vmem %s1138_s5, 256 }
  0x49   : > { %p1140_p13 = scmp.lt.s32.totalorder %s331_s30, %s1138_s5  ;;  %p1141_p1 = scmp.lt.s32.totalorder %s1139_s22, %s1132_s17 }
  0x4a   : > { %p1136_p9 = pneg %p1135_p6 }
  0x4b   : > { %p1142_p4 = por %p1141_p1, %p1140_p13 }
  0x4d   : > { %p1143_p8 = pnand %p1142_p4, %p1136_p9 }
  0x4f   : > { %1146 = shalt.err (!%p1143_p8)
}
  0x50   : > { %971 = dma.hbm_to_vmem [thread:$0]  (!%p1405_p2), %s328_s10, 128, %s331_s30, %s320_s2  }
  0x51   : > { %p1549_p12 = scmp.ne.s32.totalorder %s1542_s13, 0 }
  0x52   : > { %s1416_s14 = sand.u32 (!%p1549_p12), 1, %s1219_s25   ;;  %p1550_p5 = scmp.ne.s32.totalorder (!%p1549_p12), %s1540_s11, 0 }
  0x53   : > { %339 = sbr.rel (%p1549_p12) target bundleno = 537 (0x219), region = 48  ;;  %s844_s20 = sshll.u32 (!%p1549_p12), %s1416_s14, 3 }
  0x54   : > { %s342_s19 = scalar_lea.sflag (!%p1549_p12), [#allocation4], %s1416_s14  ;;  %s345_s5 = scalar_lea.vmem (!%p1549_p12), [#allocation3], %s844_s20 }
  0x58   : > { %1198 = dma.done.wait (%p1550_p5), %s342_s19, 128  }
  0x59   : > { %1200 = vsyncadd (%p1550_p5), %s342_s19, 4294967168  ;;  %p1551_p3 = scmp.ne.s32.totalorder %s1538_s9, 0 }
  0x5b   : > { %1202 = dma.done.wait (%p1551_p3), [#allocation7], 1024  }
  0x5c   : > { %1204 = vsyncadd (%p1551_p3), [#allocation7], 4294966272 }
  0x5d   : > { %1206 = dma.done.wait (%p1551_p3), [#allocation10], 2048  }
  0x5e   : > { %1208 = vsyncadd (%p1551_p3), [#allocation10], 4294965248  ;;  %v1243_v0 = vmov 0.0   ;;  %vm1244_vm0 = vmmov 0   ;;  %v410_v1 = vld [vmem:[#allocation6 + $0x18] sm:$0xff]  ;;  %v409_v2 = vld [vmem:[#allocation6 + $0x10] sm:$0xff] }
  0x5f   : > { %885 = vmatprep.subr.mxu1 %v1243_v0  ;;  %893 = vmatprep.mubr.msk.f32.mxu1 %vm1244_vm0, %v1243_v0  ;;  %v408_v3 = vld [vmem:[#allocation6 + $0x8] sm:$0xff]  ;;  %v407_v4 = vld [vmem:[#allocation6] sm:$0xff]  ;;  %v406_v5 = vld [vmem:[%s345_s5] sm:$0xff]  ;;  %vm418_vm1 = vcmask 261120   ;;  %s855_s10 = sshll.u32 %s1227_s27, 7  ;;  %s393_s21 = scalar_lea.vmem [#allocation11], %s844_s20 }
  0x60   : > { %907 = vmatprep.subr.mxu0 %v1243_v0  ;;  %939 = vmatprep.mubr.msk.f32.mxu0 %vm1244_vm0, %v1243_v0  ;;  %v495_v6 = vld [vmem:[#allocation8 + $0x18] sm:$0xff]  ;;  %v494_v7 = vld [vmem:[#allocation8 + $0x10] sm:$0xff]  ;;  %v493_v8 = vld [vmem:[#allocation8 + $0x8] sm:$0xff]  ;;  %s695_s30 = sshll.u32 %s393_s21, 4  ;;  %s1481_s22 = scalar_lea.hbm %s1530_s7, %s855_s10  ;;  %s696_s30 = int_to_ptr.vmem [resolvable:$true] %s695_s30 }
  0x61   : > { %886 = vmatpush3.msra.mxu1 %v410_v1  ;;  %v492_v9 = vld [vmem:[#allocation8] sm:$0xff]  ;;  %v595_v10 = vld [vmem:[#allocation9 + $0x78] sm:$0xff]  ;;  %v594_v11 = vld [vmem:[#allocation9 + $0x70] sm:$0xff]  ;;  %s682_s19 = scalar_lea.sflag [#allocation5], %s1416_s14  ;;  %s1147_s5 = scalar_lea.vmem %s696_s30, 128 }
  0x62   : > { %887 = vmatprep.subr.mxu1 %v1243_v0  ;;  %908 = vmatpush3.msra.mxu0 %v595_v10  ;;  %v593_v12 = vld [vmem:[#allocation9 + $0x68] sm:$0xff]  ;;  %v592_v13 = vld [vmem:[#allocation9 + $0x60] sm:$0xff]  ;;  %v591_v14 = vld [vmem:[#allocation9 + $0x58] sm:$0xff]  ;;  %p1148_p10 = scmp.ne.s32.totalorder %s696_s30, %s1147_s5  ;;  %s1245_s27 = smov [#allocation11]  }
  0x63   : > { %888 = vmatpush3.msra.mxu1 %v409_v2  ;;  %909 = vmatprep.subr.mxu0 %v1243_v0  ;;  %v590_v15 = vld [vmem:[#allocation9 + $0x50] sm:$0xff]  ;;  %v589_v16 = vld [vmem:[#allocation9 + $0x48] sm:$0xff]  ;;  %v588_v17 = vld [vmem:[#allocation9 + $0x40] sm:$0xff]  ;;  %s1151_s1 = sshll.u32 %s1245_s27, 4  ;;  %s1152_s1 = int_to_ptr.vmem [resolvable:$false] %s1151_s1 }
  0x64   : > { %889 = vmatprep.subr.mxu1 %v1243_v0  ;;  %910 = vmatpush3.msra.mxu0 %v594_v11  ;;  %v587_v18 = vld [vmem:[#allocation9 + $0x38] sm:$0xff]  ;;  %v586_v19 = vld [vmem:[#allocation9 + $0x30] sm:$0xff]  ;;  %v585_v20 = vld [vmem:[#allocation9 + $0x28] sm:$0xff]  ;;  %p1149_p2 = pnand %p1148_p10, %p1386_p0  ;;  %s1153_s20 = scalar_lea.vmem %s1152_s1, 256 }
  0x65   : > { %890 = vmatpush3.msra.mxu1 %v408_v3  ;;  %911 = vmatprep.subr.mxu0 %v1243_v0  ;;  %v584_v21 = vld [vmem:[#allocation9 + $0x20] sm:$0xff]  ;;  %v583_v22 = vld [vmem:[#allocation9 + $0x18] sm:$0xff]  ;;  %v582_v23 = vld [vmem:[#allocation9 + $0x10] sm:$0xff]  ;;  %p1154_p7 = scmp.lt.s32.totalorder %s696_s30, %s1152_s1  ;;  %p1155_p6 = scmp.lt.s32.totalorder %s1153_s20, %s1147_s5 }
  0x66   : > { %891 = vmatprep.subr.mxu1 %v1243_v0  ;;  %912 = vmatpush3.msra.mxu0 %v593_v12  ;;  %v581_v24 = vld [vmem:[#allocation9 + $0x8] sm:$0xff]  ;;  %v580_v25 = vld [vmem:[#allocation9] sm:$0xff]  ;;  %v851_v28 = vld [vmem:[%s1527_s4] ss:$0 sm:$0xff]  ;;  %p1150_p11 = pneg %p1149_p2 }
  0x67   : > { %892 = vmatpush3.msra.mxu1 %v407_v4  ;;  %913 = vmatprep.subr.mxu0 %v1243_v0  ;;  %v849_v34 = vld [vmem:[%s1526_s3] ss:$0 sm:$0xff]  ;;  %p1156_p9 = por %p1155_p6, %p1154_p7 }
  0x68   : > { %894 = vmatmul.mubr.msk.f32.vlgmr.msra.gmra.mxu1 %vm418_vm1, %v406_v5  ;;  %896 = vmatprep.subr.mxu1 %v1243_v0  ;;  %v853_v40 = vld [vmem:[%s1529_s6] ss:$0 sm:$0xff] }
  0x69   : > { %897 = vmatpush3.msra.mxu1 %v495_v6  ;;  %904 = vmatprep.mubr.msk.f32.mxu1 %vm1244_vm0, %v1243_v0  ;;  %p1157_p13 = pnand %p1156_p9, %p1150_p11 }
  0x6a   : > { %898 = vmatprep.subr.mxu1 %v1243_v0  ;;  %914 = vmatpush3.msra.mxu0 %v592_v13 }
  0x6b   : > { %899 = vmatpush3.msra.mxu1 %v494_v7  ;;  %915 = vmatprep.subr.mxu0 %v1243_v0 }
  0x6c   : > { %900 = vmatprep.subr.mxu1 %v1243_v0  ;;  %916 = vmatpush3.msra.mxu0 %v591_v14 }
  0x6d   : > { %901 = vmatpush3.msra.mxu1 %v493_v8  ;;  %917 = vmatprep.subr.mxu0 %v1243_v0 }
  0x6e   : > { %902 = vmatprep.subr.mxu1 %v1243_v0  ;;  %918 = vmatpush3.msra.mxu0 %v590_v15 }
  0x6f   : > { %903 = vmatpush3.msra.mxu1 %v492_v9  ;;  %919 = vmatprep.subr.mxu0 %v1243_v0 }
  0x70   : > { %905 = vmatmul.mubr.msk.f32.vlgmr.msra.gmra.mxu1 %vm418_vm1, %v406_v5  ;;  %920 = vmatpush3.msra.mxu0 %v589_v16 }
  0x71   : > { %921 = vmatprep.subr.mxu0 %v1243_v0 }
  0x72   : > { %922 = vmatpush3.msra.mxu0 %v588_v17 }
  0x73   : > { %923 = vmatprep.subr.mxu0 %v1243_v0 }
  0x74   : > { %924 = vmatpush3.msra.mxu0 %v587_v18 }
  0x75   : > { %925 = vmatprep.subr.mxu0 %v1243_v0 }
  0x76   : > { %926 = vmatpush3.msra.mxu0 %v586_v19 }
  0x77   : > { %927 = vmatprep.subr.mxu0 %v1243_v0 }
  0x78   : > { %928 = vmatpush3.msra.mxu0 %v585_v20 }
  0x79   : > { %929 = vmatprep.subr.mxu0 %v1243_v0 }
  0x7a   : > { %930 = vmatpush3.msra.mxu0 %v584_v21 }
  0x7b   : > { %931 = vmatprep.subr.mxu0 %v1243_v0 }
  0x7c   : > { %932 = vmatpush3.msra.mxu0 %v583_v22 }
  0x7d   : > { %933 = vmatprep.subr.mxu0 %v1243_v0 }
  0x7e   : > { %934 = vmatpush3.msra.mxu0 %v582_v23 }
  0x7f   : > { %935 = vmatprep.subr.mxu0 %v1243_v0 }
  0x80   : > { %936 = vmatpush3.msra.mxu0 %v581_v24 }
  0x81   : > { %937 = vmatprep.subr.mxu0 %v1243_v0 }
  0x82   : > { %938 = vmatpush3.msra.mxu0 %v580_v25 }
 0x128   : > { %v488_v26 = vpop.f32.mrf.mxu1 }
 0x129   : > { %v489_v37 = vadd.f32 %v849_v34, %v488_v26 }
 0x12a   : > { %v895_v27 = vpop.f32.mrf.mxu1 }
 0x130   : > { %v569_v29 = vpop.f32.mrf.mxu1 }
 0x131   : > { %v570_v30 = vadd.f32 %v851_v28, %v569_v29 }
 0x132   : > { %v906_v31 = vpop.f32.mrf.mxu1 }
 0x133   : > { %v574_v32 = vmul.f32 0.70710677, %v570_v30  ;;  %v573_v35 = vmul.f32 0.5, %v570_v30 }
 0x135   : > { %1039 = verf.f32 %v574_v32 }
 0x142   : > { %v1040_v33 = vpop.eup %1039 }
 0x143   : > { %v576_v36 = vadd.f32 1.0, %v1040_v33 }
 0x145   : > { %v577_v38 = vmul.f32 %v576_v36, %v573_v35 }
 0x147   : > { %v578_v39 = vmul.f32 %v577_v38, %v489_v37 }
 0x149   : > { %940 = vmatmul.mubr.f32.vlgmr.msra.gmra.mxu0 %v578_v39 }
 0x209   : > { %v662_v41 = vpop.f32.mrf.mxu0 }
 0x20a   : > { %v679_v42 = vadd.f32 %v853_v40, %v662_v41 }
 0x20b   : > { %v941_v43 = vpop.f32.mrf.mxu0 }
 0x20c   : > { %680 = vst [vmem:[%s393_s21] sm:$0xff] %v679_v42 }
 0x20d   : > { %1160 = shalt.err (!%p1157_p13)
}
 0x20e   : > { %s1161_s2 = scalar_lea.hbm %s1481_s22, 128  ;;  %s1165_s11 = scalar_lea.hbm %s1530_s7, 256 }
 0x20f   : > { %p1162_p1 = scmp.ne.s32.totalorder %s1481_s22, %s1161_s2  ;;  %p1166_p12 = scmp.lt.s32.totalorder %s1481_s22, %s1530_s7 }
 0x210   : > { %p1167_p5 = scmp.lt.s32.totalorder %s1165_s11, %s1161_s2 }
 0x211   : > { %p1163_p4 = pnand %p1162_p1, %p1386_p0 }
 0x212   : > { %p1168_p3 = por %p1167_p5, %p1166_p12 }
 0x213   : > { %p1164_p8 = pneg %p1163_p4 }
 0x215   : > { %p1169_p10 = pnand %p1168_p3, %p1164_p8 }
 0x217   : > { %1172 = shalt.err (!%p1169_p10)
}
 0x218   : > { %956 = dma.vmem_to_hbm [thread:$0]  (%p1386_p0), %s696_s30, 128, %s1481_s22, %s682_s19  }
 0x219 PF: > { %s707_s10 = sand.u32 1, %s1215_s24   ;;  %p1552_p2 = scmp.ne.s32.totalorder %s1541_s12, 0 }
 0x21a   : > { %p1553_p11 = scmp.ge.s32.totalorder %s1235_s29, 2  ;;  %s708_s21 = scalar_lea.sflag [#allocation5], %s707_s10 }
 0x21c   : > { %p973_p7 = pnand %p1553_p11, %p1552_p2 }
 0x21e   : > { %p974_p6 = pneg %p973_p7 }
 0x220   : > { %1210 = dma.done.wait (%p974_p6), %s708_s21, 128  }
 0x221   : > { %1212 = vsyncadd (%p974_p6), %s708_s21, 4294967168  ;;  %s25_s29 = sadd.s32 1, %s1235_s29   ;;  %s1554_s24 = smov %s1219_s25 }
 0x222   : > { %p22_p9 = scmp.ge.s32.totalorder %s25_s29, 4   ;;  %s1555_s25 = smov %s1223_s26 }
 0x223   : > { %s1556_s26 = smov %s1398_s23  ;;  %s1557_s27 = smov %s1231_s28 }
 0x224   : > { %s1558_s28 = smov %s1560_s8  ;;  %24 = sbr.rel (!%p22_p9) target bundleno = 12 (0xc), region = 122 }
 0x229   :  { %713 = vsyncpa [#allocation4], 1 }
 0x22a   :  { %715 = vsyncpa [#allocation4 + $0x1], 1 }
 0x22b   :  { %716 = vsyncpa [#allocation7], 1 }
 0x22c   :  { %717 = vsyncpa [#allocation10], 1 }
 0x22d   :  { %718 = vsyncpa [#allocation5], 1 }
 0x22e   :  { %720 = vsyncpa [#allocation5 + $0x1], 1 }

</bundles_post_ra>
